<compile_context>
chip_gen: v7x
topology: tpu7x:2x2x1
jax: 0.10.0
libtpu: 0.0.40
codegen_flags: <defaults>
</compile_context>

<pallas_src>
import functools
import math

import jax
import jax.numpy as jnp
from jax.experimental import pallas as pl
from jax.experimental.pallas import tpu as pltpu

D_MODEL = 4
NUM_HEADS = 2
D_HEAD = D_MODEL // NUM_HEADS
LANE = 128


def mha_kernel(xq_ref, xk_ref, xv_ref,
               wq_ref, bq_ref, wk_ref, bk_ref, wv_ref, bv_ref,
               wo_ref, bo_ref,
               proj_ref, attn_ref,
               *, num_heads, d_head, batch_tile, seq_len, mxu_dtype):
    H, d, Bt, S = num_heads, d_head, batch_tile, seq_len
    BtS = Bt * S
    Dp = wo_ref.shape[1]                      # lane-padded output width (>=128)
    f32 = jnp.float32

    # Inputs already flattened to (Bt*S, D) by the wrapper -> no in-kernel reshape.
    xq = xq_ref[...].astype(mxu_dtype)
    xk = xk_ref[...].astype(mxu_dtype)
    xv = xv_ref[...].astype(mxu_dtype)

    # Fused all-heads QKV projections: ONE matmul per stream.  Wq/bq carry the
    # 1/sqrt(d_head) score scale (folded in f32 in the wrapper).  Biases are f32.
    q = jnp.dot(xq, wq_ref[...], preferred_element_type=f32) + bq_ref[...]
    k = jnp.dot(xk, wk_ref[...], preferred_element_type=f32) + bk_ref[...]
    v = jnp.dot(xv, wv_ref[...], preferred_element_type=f32) + bv_ref[...]
    # q, k, v: (BtS, H*d) f32, head-major along lanes.

    # Regroup heads into the batch dim: (BtS, H*d) -> (H*Bt, S, d).
    # Static lane slices + leading-dim reshape + leading-axis concat only
    # (no minor-dim transposes / relayouts).
    def split_heads(x):
        return jnp.concatenate(
            [x[:, h * d:(h + 1) * d].reshape(Bt, S, d) for h in range(H)], axis=0)

    qh = split_heads(q)
    kh = split_heads(k)
    vh = split_heads(v)

    # Scores for ALL heads in one batched contraction (scale already folded).
    # NOTE: at D=4 / d_head=2 these contractions barely use the MXU; for real
    # shapes pad/stack the head dim to >=128 (>=256 on v6e/v7x) — kept as the
    # general einsum template here.
    s = jnp.einsum('bqd,bkd->bqk', qh.astype(mxu_dtype), kh.astype(mxu_dtype),
                   preferred_element_type=f32)               # (H*Bt, S, S)
    # TODO(synk): optional `mask` argument of the torch module not plumbed
    # (forward is exercised with mask=None).

    # Softmax strictly in f32 (v5e has no bf16 VPU/EUP).  Exact reciprocal kept
    # for 1e-5 parity with the reference; pl.reciprocal(..., approx=True) moves
    # it to the EUP vrcp slot once ~1e-4 relative error is acceptable.
    m_ = jnp.max(s, axis=-1, keepdims=True)
    p = jnp.exp(s - m_)
    w = p * pl.reciprocal(jnp.sum(p, axis=-1, keepdims=True), approx=False)

    # ONE attention-weights writeback for all heads.  Layout (H, Bt, S, S)
    # mirrors torch's stack(heads) before the final permute (done in wrapper).
    attn_ref[...] = w.reshape(H, Bt, S, S).astype(attn_ref.dtype)

    # Context for ALL heads in one batched contraction.
    o = jnp.einsum('bqk,bkd->bqd', w.astype(mxu_dtype), vh.astype(mxu_dtype),
                   preferred_element_type=f32)               # (H*Bt, S, d)

    # Output projection: concat(heads) @ Wo  ==  sum_h o_h @ Wo[h*d:(h+1)*d, :].
    # Wo is zero-padded to Dp>=128 lanes, so `acc` and the final store are
    # lane-dense (unmasked vst); accumulation stays f32 (MRB-friendly on v7x).
    wo = wo_ref[...]
    acc = jnp.zeros((BtS, Dp), f32)
    for h in range(H):                        # static, tiny head count
        oh = o[h * Bt:(h + 1) * Bt].reshape(BtS, d).astype(mxu_dtype)
        acc = acc + jnp.dot(oh, wo[h * d:(h + 1) * d, :],
                            preferred_element_type=f32)

    # TODO(synk): nn.Dropout(0.3) is identity in eval mode; training-mode dropout
    # (torch RNG) is not reproduced.
    proj_ref[...] = (acc + bo_ref[...]).astype(proj_ref.dtype)


def prepare_params(params, mxu_dtype=jnp.float32):
    """Hoisted weight prep (do ONCE per set of weights, reuse across calls):
    fold 1/sqrt(d_head) into Wq/bq in f32, stack per-head weights along the
    output dim (one matmul per stream), zero-pad Wo/bo to a lane-dense width,
    and cast MXU weight operands to `mxu_dtype` with a single quantization."""
    wq, bq, wk, bk, wv, bv, wo, bo = params
    H, D, d = wq.shape
    scale = 1.0 / math.sqrt(d)

    def stack_w(w):   # (H, D, d) -> (D, H*d), head-major along output lanes
        return jnp.transpose(w, (1, 0, 2)).reshape(D, H * d)

    def stack_b(b):   # (H, 1, d) -> (1, H*d)
        return jnp.transpose(b, (1, 0, 2)).reshape(1, H * d)

    wq_all = stack_w(wq * scale).astype(mxu_dtype)   # scale in f32, cast once
    bq_all = stack_b(bq * scale)                     # biases stay f32
    wk_all = stack_w(wk).astype(mxu_dtype)
    bk_all = stack_b(bk)
    wv_all = stack_w(wv).astype(mxu_dtype)
    bv_all = stack_b(bv)

    Dp = max(LANE, pl.cdiv(D, LANE) * LANE)          # lane-dense projection width
    wo_p = jnp.zeros((D, Dp), jnp.float32).at[:, :D].set(wo).astype(mxu_dtype)
    bo_p = jnp.zeros((1, Dp), jnp.float32).at[:, :D].set(bo.reshape(1, D))
    return (wq_all, bq_all, wk_all, bk_all, wv_all, bv_all, wo_p, bo_p)


def mha_forward(pre_q, pre_k, pre_v, prepped, *, num_heads=NUM_HEADS,
                batch_tile=None, mxu_dtype=jnp.float32):
    """batch_tile=None -> one grid step (recommended at this size on all gens,
    incl. v7x: per-step work is far below the ~0.35us step overhead, so megacore
    sharding would only add cost).  Set batch_tile=B//2 only once each shard is
    compute-bound."""
    wq_all, bq_all, wk_all, bk_all, wv_all, bv_all, wo_p, bo_p = prepped
    B, S, D = pre_q.shape
    H = num_heads
    d = wq_all.shape[1] // H
    Dp = wo_p.shape[1]

    if batch_tile is None:
        batch_tile = B
    assert B % batch_tile == 0
    Bt = batch_tile
    nb = B // Bt
    BtS = Bt * S

    # (B,S,D)->(B*S,D) collapse done in the wrapper (free layout plumbing).
    xq = pre_q.reshape(B * S, D)
    xk = pre_k.reshape(B * S, D)
    xv = pre_v.reshape(B * S, D)

    kern = functools.partial(mha_kernel, num_heads=H, d_head=d,
                             batch_tile=Bt, seq_len=S, mxu_dtype=mxu_dtype)

    spec_x = pl.BlockSpec((BtS, D), lambda b: (b, 0))
    spec_w = pl.BlockSpec(wq_all.shape, lambda b: (0, 0))
    spec_b = pl.BlockSpec(bq_all.shape, lambda b: (0, 0))
    spec_wo = pl.BlockSpec(wo_p.shape, lambda b: (0, 0))
    spec_bo = pl.BlockSpec(bo_p.shape, lambda b: (0, 0))
    out_proj_spec = pl.BlockSpec((BtS, Dp), lambda b: (b, 0))
    out_attn_spec = pl.BlockSpec((H, Bt, S, S), lambda b: (0, b, 0, 0))

    # TODO(synk): before scaling S, add a query-tile grid axis (or drop the
    # materialized attention-weights output, flash-style) and set
    # vmem_limit_bytes — the double-buffered (Bt,H,S,S) attn block overflows
    # v7x's 64 MiB VMEM long before v5e/v6e's 128 MiB.
    proj_flat, attn_hb = pl.pallas_call(
        kern,
        out_shape=(jax.ShapeDtypeStruct((B * S, Dp), jnp.float32),
                   jax.ShapeDtypeStruct((H, B, S, S), jnp.float32)),
        grid_spec=pltpu.PrefetchScalarGridSpec(
            num_scalar_prefetch=0,
            grid=(nb,),
            in_specs=[spec_x, spec_x, spec_x,
                      spec_w, spec_b, spec_w, spec_b, spec_w, spec_b,
                      spec_wo, spec_bo],
            out_specs=(out_proj_spec, out_attn_spec)),
        compiler_params=pltpu.CompilerParams(
            dimension_semantics=("parallel",)),
    )(xq, xk, xv, wq_all, bq_all, wk_all, bk_all, wv_all, bv_all, wo_p, bo_p)

    proj = proj_flat[:, :D].reshape(B, S, D)
    attn = jnp.transpose(attn_hb, (1, 0, 2, 3))   # == torch stack().permute(1,0,2,3)
    return proj, attn


def multi_head_attention(pre_q, pre_k, pre_v, params, **kw):
    """Convenience wrapper; prefer prepare_params() once + mha_forward() per call."""
    mxu_dtype = kw.get("mxu_dtype", jnp.float32)
    return mha_forward(pre_q, pre_k, pre_v, prepare_params(params, mxu_dtype), **kw)


def init_params(key):
    """Deterministic init mimicking torch nn.Linear's U(-1/sqrt(fan_in), 1/sqrt(fan_in))."""
    ks = jax.random.split(key, 8)
    lim = 1.0 / math.sqrt(D_MODEL)
    wq = jax.random.uniform(ks[0], (NUM_HEADS, D_MODEL, D_HEAD), jnp.float32, -lim, lim)
    bq = jax.random.uniform(ks[1], (NUM_HEADS, 1, D_HEAD), jnp.float32, -lim, lim)
    wk = jax.random.uniform(ks[2], (NUM_HEADS, D_MODEL, D_HEAD), jnp.float32, -lim, lim)
    bk = jax.random.uniform(ks[3], (NUM_HEADS, 1, D_HEAD), jnp.float32, -lim, lim)
    wv = jax.random.uniform(ks[4], (NUM_HEADS, D_MODEL, D_HEAD), jnp.float32, -lim, lim)
    bv = jax.random.uniform(ks[5], (NUM_HEADS, 1, D_HEAD), jnp.float32, -lim, lim)
    wo = jax.random.uniform(ks[6], (D_MODEL, D_MODEL), jnp.float32, -lim, lim)
    bo = jax.random.uniform(ks[7], (1, D_MODEL), jnp.float32, -lim, lim)
    return (wq, bq, wk, bk, wv, bv, wo, bo)


def reference(pre_q, pre_k, pre_v, params):
    """Pure-JAX reference replicating the torch forward (eval mode, mask=None)."""
    wq, bq, wk, bk, wv, bv, wo, bo = params
    outs, attns = [], []
    for h in range(NUM_HEADS):
        Q = pre_q @ wq[h] + bq[h]
        K = pre_k @ wk[h] + bk[h]
        V = pre_v @ wv[h] + bv[h]
        scores = jnp.einsum("bqd,bkd->bqk", Q, K) / math.sqrt(D_HEAD)
        w = jax.nn.softmax(scores, axis=-1)
        outs.append(jnp.einsum("bqk,bkd->bqd", w, V))
        attns.append(w)
    out = jnp.concatenate(outs, axis=-1)
    attn = jnp.stack(attns).transpose(1, 0, 2, 3)
    proj = out @ wo + bo
    return proj, attn


if __name__ == "__main__":
    key = jax.random.PRNGKey(0)
    k_params, k_q, k_k, k_v = jax.random.split(key, 4)

    B, S = 2, 8
    params = init_params(k_params)
    pre_q = jax.random.normal(k_q, (B, S, D_MODEL), jnp.float32)
    pre_k = jax.random.normal(k_k, (B, S, D_MODEL), jnp.float32)
    pre_v = jax.random.normal(k_v, (B, S, D_MODEL), jnp.float32)

    # Weight re-stacking hoisted out of the forward path (done once).
    prepped = prepare_params(params)
    fwd = jax.jit(mha_forward)

    proj, attn = fwd(pre_q, pre_k, pre_v, prepped)
    jax.block_until_ready((proj, attn))

    proj_r, attn_r = reference(pre_q, pre_k, pre_v, params)
    assert proj.shape == (B, S, D_MODEL)
    assert attn.shape == (B, NUM_HEADS, S, S)
    assert jnp.allclose(proj, proj_r, atol=1e-5, rtol=1e-5)
    assert jnp.allclose(attn, attn_r, atol=1e-5, rtol=1e-5)

    # Optional bf16 MXU-operand mode (v6e/v7x review item); softmax and
    # accumulation remain f32, so only bf16-level rounding is introduced.
    prepped_bf16 = prepare_params(params, mxu_dtype=jnp.bfloat16)
    proj_b, attn_b = mha_forward(pre_q, pre_k, pre_v, prepped_bf16,
                                 mxu_dtype=jnp.bfloat16)
    jax.block_until_ready((proj_b, attn_b))
    assert jnp.allclose(proj_b, proj_r, atol=5e-2, rtol=5e-2)
    assert jnp.allclose(attn_b, attn_r, atol=5e-2, rtol=5e-2)

    print("KERNEL_OK")
</pallas_src>

<mosaic_0001>
module attributes {stable_mosaic.version = 11 : i64} {
  func.func @mha_kernel(%arg0: i32, %arg1: memref<16x4xf32, #tpu.memory_space<vmem>>, %arg2: memref<16x4xf32, #tpu.memory_space<vmem>>, %arg3: memref<16x4xf32, #tpu.memory_space<vmem>>, %arg4: memref<4x4xf32, #tpu.memory_space<vmem>>, %arg5: memref<1x4xf32, #tpu.memory_space<vmem>>, %arg6: memref<4x4xf32, #tpu.memory_space<vmem>>, %arg7: memref<1x4xf32, #tpu.memory_space<vmem>>, %arg8: memref<4x4xf32, #tpu.memory_space<vmem>>, %arg9: memref<1x4xf32, #tpu.memory_space<vmem>>, %arg10: memref<4x128xf32, #tpu.memory_space<vmem>>, %arg11: memref<1x128xf32, #tpu.memory_space<vmem>>, %arg12: memref<16x128xf32, #tpu.memory_space<vmem>>, %arg13: memref<2x2x8x8xf32, #tpu.memory_space<vmem>>) attributes {dimension_semantics = [#tpu.dimension_semantics<parallel>], iteration_bounds = array<i64: 1>, scalar_prefetch = 0 : i64, scratch_operands = 0 : i64, tpu.core_type = #tpu.core_type<tc>, window_params = [{transform_indices = @transform_0, window_bounds = array<i64: 16, 4>}, {transform_indices = @transform_1, window_bounds = array<i64: 16, 4>}, {transform_indices = @transform_2, window_bounds = array<i64: 16, 4>}, {pipeline_mode = #tpu.pipeline_mode<synchronous>, transform_indices = @transform_3, window_bounds = array<i64: 4, 4>}, {pipeline_mode = #tpu.pipeline_mode<synchronous>, transform_indices = @transform_4, window_bounds = array<i64: 1, 4>}, {pipeline_mode = #tpu.pipeline_mode<synchronous>, transform_indices = @transform_5, window_bounds = array<i64: 4, 4>}, {pipeline_mode = #tpu.pipeline_mode<synchronous>, transform_indices = @transform_6, window_bounds = array<i64: 1, 4>}, {pipeline_mode = #tpu.pipeline_mode<synchronous>, transform_indices = @transform_7, window_bounds = array<i64: 4, 4>}, {pipeline_mode = #tpu.pipeline_mode<synchronous>, transform_indices = @transform_8, window_bounds = array<i64: 1, 4>}, {pipeline_mode = #tpu.pipeline_mode<synchronous>, transform_indices = @transform_9, window_bounds = array<i64: 4, 128>}, {pipeline_mode = #tpu.pipeline_mode<synchronous>, transform_indices = @transform_10, window_bounds = array<i64: 1, 128>}, {transform_indices = @transform_11, window_bounds = array<i64: 16, 128>}, {transform_indices = @transform_12, window_bounds = array<i64: 2, 2, 8, 8>}]} {
    %c0 = arith.constant 0 : index
    %c0_0 = arith.constant 0 : index
    %0 = vector.load %arg1[%c0, %c0_0] : memref<16x4xf32, #tpu.memory_space<vmem>>, vector<16x4xf32>
    %c0_1 = arith.constant 0 : index
    %c0_2 = arith.constant 0 : index
    %1 = vector.load %arg2[%c0_1, %c0_2] : memref<16x4xf32, #tpu.memory_space<vmem>>, vector<16x4xf32>
    %c0_3 = arith.constant 0 : index
    %c0_4 = arith.constant 0 : index
    %2 = vector.load %arg3[%c0_3, %c0_4] : memref<16x4xf32, #tpu.memory_space<vmem>>, vector<16x4xf32>
    %c0_5 = arith.constant 0 : index
    %c0_6 = arith.constant 0 : index
    %3 = vector.load %arg4[%c0_5, %c0_6] : memref<4x4xf32, #tpu.memory_space<vmem>>, vector<4x4xf32>
    %cst = arith.constant dense<0.000000e+00> : vector<16x4xf32>
    %4 = tpu.matmul %0, %3, %cst {dimension_numbers = #tpu.dot_dimension_numbers<[1], [0], [0], [1], [0, 0, 1, 1], [], []>} : vector<16x4xf32>, vector<4x4xf32>, vector<16x4xf32> -> vector<16x4xf32>
    %c0_7 = arith.constant 0 : index
    %c0_8 = arith.constant 0 : index
    %5 = vector.load %arg5[%c0_7, %c0_8] : memref<1x4xf32, #tpu.memory_space<vmem>>, vector<1x4xf32>
    %6 = vector.broadcast %5 : vector<1x4xf32> to vector<16x4xf32>
    %7 = arith.addf %4, %6 : vector<16x4xf32>
    %c0_9 = arith.constant 0 : index
    %c0_10 = arith.constant 0 : index
    %8 = vector.load %arg6[%c0_9, %c0_10] : memref<4x4xf32, #tpu.memory_space<vmem>>, vector<4x4xf32>
    %cst_11 = arith.constant dense<0.000000e+00> : vector<16x4xf32>
    %9 = tpu.matmul %1, %8, %cst_11 {dimension_numbers = #tpu.dot_dimension_numbers<[1], [0], [0], [1], [0, 0, 1, 1], [], []>} : vector<16x4xf32>, vector<4x4xf32>, vector<16x4xf32> -> vector<16x4xf32>
    %c0_12 = arith.constant 0 : index
    %c0_13 = arith.constant 0 : index
    %10 = vector.load %arg7[%c0_12, %c0_13] : memref<1x4xf32, #tpu.memory_space<vmem>>, vector<1x4xf32>
    %11 = vector.broadcast %10 : vector<1x4xf32> to vector<16x4xf32>
    %12 = arith.addf %9, %11 : vector<16x4xf32>
    %c0_14 = arith.constant 0 : index
    %c0_15 = arith.constant 0 : index
    %13 = vector.load %arg8[%c0_14, %c0_15] : memref<4x4xf32, #tpu.memory_space<vmem>>, vector<4x4xf32>
    %cst_16 = arith.constant dense<0.000000e+00> : vector<16x4xf32>
    %14 = tpu.matmul %2, %13, %cst_16 {dimension_numbers = #tpu.dot_dimension_numbers<[1], [0], [0], [1], [0, 0, 1, 1], [], []>} : vector<16x4xf32>, vector<4x4xf32>, vector<16x4xf32> -> vector<16x4xf32>
    %c0_17 = arith.constant 0 : index
    %c0_18 = arith.constant 0 : index
    %15 = vector.load %arg9[%c0_17, %c0_18] : memref<1x4xf32, #tpu.memory_space<vmem>>, vector<1x4xf32>
    %16 = vector.broadcast %15 : vector<1x4xf32> to vector<16x4xf32>
    %17 = arith.addf %14, %16 : vector<16x4xf32>
    %18 = vector.extract_strided_slice %7 {offsets = [0, 0], sizes = [16, 2], strides = [1, 1]} : vector<16x4xf32> to vector<16x2xf32>
    %19 = vector.shape_cast %18 : vector<16x2xf32> to vector<2x8x2xf32>
    %20 = vector.extract_strided_slice %7 {offsets = [0, 2], sizes = [16, 2], strides = [1, 1]} : vector<16x4xf32> to vector<16x2xf32>
    %21 = vector.shape_cast %20 : vector<16x2xf32> to vector<2x8x2xf32>
    %22 = tpu.concatenate %19, %21 in 0 : vector<2x8x2xf32>, vector<2x8x2xf32> -> vector<4x8x2xf32>
    %23 = vector.extract_strided_slice %12 {offsets = [0, 0], sizes = [16, 2], strides = [1, 1]} : vector<16x4xf32> to vector<16x2xf32>
    %24 = vector.shape_cast %23 : vector<16x2xf32> to vector<2x8x2xf32>
    %25 = vector.extract_strided_slice %12 {offsets = [0, 2], sizes = [16, 2], strides = [1, 1]} : vector<16x4xf32> to vector<16x2xf32>
    %26 = vector.shape_cast %25 : vector<16x2xf32> to vector<2x8x2xf32>
    %27 = tpu.concatenate %24, %26 in 0 : vector<2x8x2xf32>, vector<2x8x2xf32> -> vector<4x8x2xf32>
    %28 = vector.extract_strided_slice %17 {offsets = [0, 0], sizes = [16, 2], strides = [1, 1]} : vector<16x4xf32> to vector<16x2xf32>
    %29 = vector.shape_cast %28 : vector<16x2xf32> to vector<2x8x2xf32>
    %30 = vector.extract_strided_slice %17 {offsets = [0, 2], sizes = [16, 2], strides = [1, 1]} : vector<16x4xf32> to vector<16x2xf32>
    %31 = vector.shape_cast %30 : vector<16x2xf32> to vector<2x8x2xf32>
    %32 = tpu.concatenate %29, %31 in 0 : vector<2x8x2xf32>, vector<2x8x2xf32> -> vector<4x8x2xf32>
    "tpu.trace_start"() <{level = 10 : i32, message = "bqd,bkd->bqk"}> : () -> ()
    %cst_19 = arith.constant dense<0.000000e+00> : vector<4x8x8xf32>
    %33 = tpu.matmul %22, %27, %cst_19 {dimension_numbers = #tpu.dot_dimension_numbers<[2], [2], [1], [1], [0, 0, 0, 1, 1, 1], [0], [0]>} : vector<4x8x2xf32>, vector<4x8x2xf32>, vector<4x8x8xf32> -> vector<4x8x8xf32>
    "tpu.trace_stop"() : () -> ()
    %cst_20 = arith.constant dense<0xFF800000> : vector<4x8xf32>
    %34 = vector.multi_reduction <maximumf>, %33, %cst_20 [2] : vector<4x8x8xf32> to vector<4x8xf32>
    %35 = vector.shape_cast %34 : vector<4x8xf32> to vector<4x8x1xf32>
    %36 = vector.broadcast %35 : vector<4x8x1xf32> to vector<4x8x8xf32>
    %37 = arith.subf %33, %36 : vector<4x8x8xf32>
    %38 = math.exp %37 : vector<4x8x8xf32>
    %cst_21 = arith.constant dense<0.000000e+00> : vector<4x8xf32>
    %39 = vector.multi_reduction <add>, %38, %cst_21 [2] : vector<4x8x8xf32> to vector<4x8xf32>
    %40 = vector.shape_cast %39 : vector<4x8xf32> to vector<4x8x1xf32>
    %41 = tpu.reciprocal %40 : vector<4x8x1xf32> -> vector<4x8x1xf32>
    %42 = vector.broadcast %41 : vector<4x8x1xf32> to vector<4x8x8xf32>
    %43 = arith.mulf %38, %42 : vector<4x8x8xf32>
    %44 = vector.shape_cast %43 : vector<4x8x8xf32> to vector<2x2x8x8xf32>
    %c0_22 = arith.constant 0 : index
    %c0_23 = arith.constant 0 : index
    %c0_24 = arith.constant 0 : index
    %c0_25 = arith.constant 0 : index
    %45 = vector.load %arg13[%c0_22, %c0_23, %c0_24, %c0_25] : memref<2x2x8x8xf32, #tpu.memory_space<vmem>>, vector<2x2x8x8xf32>
    tpu.vector_store %arg13[%c0_22, %c0_23, %c0_24, %c0_25], %44 {strides = array<i32>} : memref<2x2x8x8xf32, #tpu.memory_space<vmem>>, vector<2x2x8x8xf32>,
    "tpu.trace_start"() <{level = 10 : i32, message = "bqk,bkd->bqd"}> : () -> ()
    %cst_26 = arith.constant dense<0.000000e+00> : vector<4x8x2xf32>
    %46 = tpu.matmul %43, %32, %cst_26 {dimension_numbers = #tpu.dot_dimension_numbers<[2], [1], [1], [2], [0, 0, 0, 1, 1, 2], [0], [0]>} : vector<4x8x8xf32>, vector<4x8x2xf32>, vector<4x8x2xf32> -> vector<4x8x2xf32>
    "tpu.trace_stop"() : () -> ()
    %c0_27 = arith.constant 0 : index
    %c0_28 = arith.constant 0 : index
    %47 = vector.load %arg10[%c0_27, %c0_28] : memref<4x128xf32, #tpu.memory_space<vmem>>, vector<4x128xf32>
    %cst_29 = arith.constant 0.000000e+00 : f32
    %48 = vector.broadcast %cst_29 : f32 to vector<16x128xf32>
    %49 = vector.extract_strided_slice %46 {offsets = [0, 0, 0], sizes = [2, 8, 2], strides = [1, 1, 1]} : vector<4x8x2xf32> to vector<2x8x2xf32>
    %50 = vector.shape_cast %49 : vector<2x8x2xf32> to vector<16x2xf32>
    %51 = vector.extract_strided_slice %47 {offsets = [0, 0], sizes = [2, 128], strides = [1, 1]} : vector<4x128xf32> to vector<2x128xf32>
    %cst_30 = arith.constant dense<0.000000e+00> : vector<16x128xf32>
    %52 = tpu.matmul %50, %51, %cst_30 {dimension_numbers = #tpu.dot_dimension_numbers<[1], [0], [0], [1], [0, 0, 1, 1], [], []>} : vector<16x2xf32>, vector<2x128xf32>, vector<16x128xf32> -> vector<16x128xf32>
    %53 = arith.addf %48, %52 : vector<16x128xf32>
    %54 = vector.extract_strided_slice %46 {offsets = [2, 0, 0], sizes = [2, 8, 2], strides = [1, 1, 1]} : vector<4x8x2xf32> to vector<2x8x2xf32>
    %55 = vector.shape_cast %54 : vector<2x8x2xf32> to vector<16x2xf32>
    %56 = vector.extract_strided_slice %47 {offsets = [2, 0], sizes = [2, 128], strides = [1, 1]} : vector<4x128xf32> to vector<2x128xf32>
    %cst_31 = arith.constant dense<0.000000e+00> : vector<16x128xf32>
    %57 = tpu.matmul %55, %56, %cst_31 {dimension_numbers = #tpu.dot_dimension_numbers<[1], [0], [0], [1], [0, 0, 1, 1], [], []>} : vector<16x2xf32>, vector<2x128xf32>, vector<16x128xf32> -> vector<16x128xf32>
    %58 = arith.addf %53, %57 : vector<16x128xf32>
    %c0_32 = arith.constant 0 : index
    %c0_33 = arith.constant 0 : index
    %59 = vector.load %arg11[%c0_32, %c0_33] : memref<1x128xf32, #tpu.memory_space<vmem>>, vector<1x128xf32>
    %60 = vector.broadcast %59 : vector<1x128xf32> to vector<16x128xf32>
    %61 = arith.addf %58, %60 : vector<16x128xf32>
    %c0_34 = arith.constant 0 : index
    %c0_35 = arith.constant 0 : index
    %62 = vector.load %arg12[%c0_34, %c0_35] : memref<16x128xf32, #tpu.memory_space<vmem>>, vector<16x128xf32>
    tpu.vector_store %arg12[%c0_34, %c0_35], %61 {strides = array<i32>} : memref<16x128xf32, #tpu.memory_space<vmem>>, vector<16x128xf32>,
    return
  }
  func.func @transform_0(%arg0: i32) -> (i32, i32) {
    %c0_i32 = arith.constant 0 : i32
    %c0_i32_0 = arith.constant 0 : i32
    return %arg0, %c0_i32 : i32, i32
  }
  func.func @transform_1(%arg0: i32) -> (i32, i32) {
    %c0_i32 = arith.constant 0 : i32
    %c0_i32_0 = arith.constant 0 : i32
    return %arg0, %c0_i32 : i32, i32
  }
  func.func @transform_2(%arg0: i32) -> (i32, i32) {
    %c0_i32 = arith.constant 0 : i32
    %c0_i32_0 = arith.constant 0 : i32
    return %arg0, %c0_i32 : i32, i32
  }
  func.func @transform_3(%arg0: i32) -> (i32, i32) {
    %c0_i32 = arith.constant 0 : i32
    %c0_i32_0 = arith.constant 0 : i32
    %c0_i32_1 = arith.constant 0 : i32
    return %c0_i32, %c0_i32_0 : i32, i32
  }
  func.func @transform_4(%arg0: i32) -> (i32, i32) {
    %c0_i32 = arith.constant 0 : i32
    %c0_i32_0 = arith.constant 0 : i32
    %c0_i32_1 = arith.constant 0 : i32
    return %c0_i32, %c0_i32_0 : i32, i32
  }
  func.func @transform_5(%arg0: i32) -> (i32, i32) {
    %c0_i32 = arith.constant 0 : i32
    %c0_i32_0 = arith.constant 0 : i32
    %c0_i32_1 = arith.constant 0 : i32
    return %c0_i32, %c0_i32_0 : i32, i32
  }
  func.func @transform_6(%arg0: i32) -> (i32, i32) {
    %c0_i32 = arith.constant 0 : i32
    %c0_i32_0 = arith.constant 0 : i32
    %c0_i32_1 = arith.constant 0 : i32
    return %c0_i32, %c0_i32_0 : i32, i32
  }
  func.func @transform_7(%arg0: i32) -> (i32, i32) {
    %c0_i32 = arith.constant 0 : i32
    %c0_i32_0 = arith.constant 0 : i32
    %c0_i32_1 = arith.constant 0 : i32
    return %c0_i32, %c0_i32_0 : i32, i32
  }
  func.func @transform_8(%arg0: i32) -> (i32, i32) {
    %c0_i32 = arith.constant 0 : i32
    %c0_i32_0 = arith.constant 0 : i32
    %c0_i32_1 = arith.constant 0 : i32
    return %c0_i32, %c0_i32_0 : i32, i32
  }
  func.func @transform_9(%arg0: i32) -> (i32, i32) {
    %c0_i32 = arith.constant 0 : i32
    %c0_i32_0 = arith.constant 0 : i32
    %c0_i32_1 = arith.constant 0 : i32
    return %c0_i32, %c0_i32_0 : i32, i32
  }
  func.func @transform_10(%arg0: i32) -> (i32, i32) {
    %c0_i32 = arith.constant 0 : i32
    %c0_i32_0 = arith.constant 0 : i32
    %c0_i32_1 = arith.constant 0 : i32
    return %c0_i32, %c0_i32_0 : i32, i32
  }
  func.func @transform_11(%arg0: i32) -> (i32, i32) {
    %c0_i32 = arith.constant 0 : i32
    %c0_i32_0 = arith.constant 0 : i32
    return %arg0, %c0_i32 : i32, i32
  }
  func.func @transform_12(%arg0: i32) -> (i32, i32, i32, i32) {
    %c0_i32 = arith.constant 0 : i32
    %c0_i32_0 = arith.constant 0 : i32
    %c0_i32_1 = arith.constant 0 : i32
    %c0_i32_2 = arith.constant 0 : i32
    return %c0_i32, %arg0, %c0_i32_0, %c0_i32_1 : i32, i32, i32, i32
  }
}

</mosaic_0001>

<bundles_post_ra>
// kernel: mha_forward.1
= control target key start
LH: loop header
LB: loop body
LE: loop exit
PB: predicated region body
PF: predicated region fallthrough
CT: control target
= control target key end

     0   :  { %vm61_vm0 = vcmask 1043456   ;;  %vm54_vm1 = vcmask 31744   ;;  %v1319_v9 = vmov 0.0   ;;  %vm1320_vm2 = vmmov 0   ;;  %s1321_s19 = smov 126   ;;  %s1517_s3 = inlined_call_operand.vmem [shape: f32[4,4], index: 3, kind: input, shape index: {}]   ;;  %s1518_s5 = inlined_call_operand.vmem [shape: f32[4,4], index: 5, kind: input, shape index: {}]   ;;  %s1519_s0 = inlined_call_operand.vmem [shape: f32[16,4], index: 0, kind: input, shape index: {}]   ;;  %s1520_s1 = inlined_call_operand.vmem [shape: f32[16,4], index: 1, kind: input, shape index: {}]   ;;  %s1521_s7 = inlined_call_operand.vmem [shape: f32[4,4], index: 7, kind: input, shape index: {}]   ;;  %s1522_s2 = inlined_call_operand.vmem [shape: f32[16,4], index: 2, kind: input, shape index: {}]   ;;  %s1523_s6 = inlined_call_operand.vmem [shape: f32[1,4], index: 6, kind: input, shape index: {}]   ;;  %s1524_s4 = inlined_call_operand.vmem [shape: f32[1,4], index: 4, kind: input, shape index: {}]   ;;  %s1525_s8 = inlined_call_operand.vmem [shape: f32[1,4], index: 8, kind: input, shape index: {}]   ;;  %s1526_s12 = inlined_call_operand.vmem [shape: f32[2,2,8,8], index: 12, kind: output, shape index: {1}]   ;;  %s1527_s9 = inlined_call_operand.vmem [shape: f32[4,128], index: 9, kind: input, shape index: {}]   ;;  %s1528_s10 = inlined_call_operand.vmem [shape: f32[1,128], index: 10, kind: input, shape index: {}]   ;;  %s1529_s11 = inlined_call_operand.vmem [shape: f32[16,128], index: 11, kind: output, shape index: {0}]  }
   0x1   :  { %v46_v0 = vld [vmem:[%s1517_s3] sm:$0xf]  ;;  %v41_v3 = vld [vmem:[%s1519_s0 + $0x8] sm:$0xff]  ;;  %vm344_vm3 = vcmask 15360   ;;  %vm641_vm4 = vcmask 64512   ;;  %vm991_vm5 = vcmask 1041408  }
   0x2   :  { %v140_v1 = vld [vmem:[%s1518_s5] sm:$0xf]  ;;  %1233 = vmatprep.subr.msk.mxu0 %vm61_vm0, %v46_v0  ;;  %v43_v5 = vld [vmem:[%s1520_s1 + $0x8] sm:$0xff] }
   0x3   :  { %v40_v2 = vld [vmem:[%s1519_s0] sm:$0xff]  ;;  %1238 = vmatprep.subr.msk.mxu1 %vm61_vm0, %v140_v1  ;;  %1234 = vmatpush3.msk.msra.mxu0 %vm61_vm0, %v46_v0  ;;  %v45_v8 = vld [vmem:[%s1522_s2 + $0x8] sm:$0xff] }
   0x4   :  { %v42_v4 = vld [vmem:[%s1520_s1] sm:$0xff]  ;;  %1235 = vmatprep.mubr.msk.f32.mxu0 %vm54_vm1, %v40_v2  ;;  %1239 = vmatpush3.msk.msra.mxu1 %vm61_vm0, %v140_v1 }
   0x5   :  { %v232_v6 = vld [vmem:[%s1521_s7] sm:$0xf]  ;;  %1240 = vmatprep.mubr.msk.f32.mxu1 %vm54_vm1, %v42_v4  ;;  %1236 = vmatmul.mubr.msk.f32.vlgmr.msra.gmra.mrb[0].mxu0 %vm54_vm1, %v41_v3 }
   0x6   :  { %1241 = vmatmul.mubr.msk.f32.vlgmr.msra.gmra.mrb[0].mxu1 %vm54_vm1, %v43_v5  ;;  %1243 = vmatprep.subr.msk.mxu0 %vm61_vm0, %v232_v6  ;;  %v44_v7 = vld [vmem:[%s1522_s2] sm:$0xff] }
   0x7   :  { %1244 = vmatpush3.msk.msra.mxu0 %vm61_vm0, %v232_v6  ;;  %1245 = vmatprep.mubr.msk.f32.mxu0 %vm54_vm1, %v44_v7  ;;  %v1175_v10 = vld [vmem:[%s1523_s6] ss:$0 sm:$0xff] }
   0x8   :  { %1253 = vmatprep.subr.mxu0 %v1319_v9  ;;  %1248 = vmatprep.subr.mxu1 %v1319_v9  ;;  %v1171_v11 = vld [vmem:[%s1524_s4] ss:$0 sm:$0xff] }
   0x9   :  { %1246 = vmatmul.mubr.msk.f32.vlgmr.msra.gmra.mrb[2].mxu0 %vm54_vm1, %v45_v8  ;;  %1250 = vmatprep.mubr.msk.f32.mxu1 %vm1320_vm2, %v1319_v9  ;;  %v1179_v22 = vld [vmem:[%s1525_s8] ss:$0 sm:$0xff] }
   0xa   :  { %1255 = vmatprep.mubr.msk.f32.mxu0 %vm1320_vm2, %v1319_v9 }
  0xd8   :  { %v1237_v12 = vpop.f32.mrb[0].mxu0 }
  0xd9   :  { %v1242_v13 = vpop.f32.mrb[0].mxu1  ;;  %v131_v15 = vpop.f32.mrb[1].mxu0  ;;  %v137_v17 = vadd.f32 %v1237_v12, %v1171_v11 }
  0xda   :  { %v229_v14 = vadd.f32 %v1242_v13, %v1175_v10  ;;  %v223_v16 = vpop.f32.mrb[1].mxu1  ;;  %v132_v18 = vadd.f32 %v1171_v11, %v131_v15 }
  0xdb   :  { %v224_v19 = vadd.f32 %v1175_v10, %v223_v16 }
  0xdc   :  { %1254 = vmatpush3.xpose.msk.msra.mxu0 %vm344_vm3, %v229_v14  ;;  %326 = vrot.lane.b32.xlu1 %v132_v18, %s1321_s19  ;;  %v1247_v20 = vpop.f32.mrb[2].mxu0 }
  0xdd   :  { %332 = vrot.lane.b32.xlu0 %v224_v19, %s1321_s19  ;;  %1249 = vmatpush3.xpose.msk.msra.mxu1 %vm344_vm3, %v224_v19  ;;  %v315_v21 = vpop.f32.mrb[3].mxu0  ;;  %v321_v27 = vadd.f32 %v1247_v20, %v1179_v22 }
  0xde   :  { %1258 = vmatprep.subr.mxu1 %v1319_v9  ;;  %1263 = vmatprep.subr.mxu0 %v1319_v9  ;;  %v316_v25 = vadd.f32 %v1179_v22, %v315_v21  ;;  %v1201_v21 = vld [vmem:[%s1528_s10] ss:$0 sm:$0xff] }
  0xdf   :  { %1256 = vmatmul.mubr.msk.f32.vlgmr.msra.gmra.mrb[4].mxu0 %vm344_vm3, %v137_v17 }
  0xe0   :  { %1251 = vmatmul.mubr.msk.f32.vlgmr.msra.gmra.mrb[2].mxu1 %vm344_vm3, %v132_v18  ;;  %1265 = vmatprep.mubr.msk.f32.mxu0 %vm1320_vm2, %v1319_v9 }
  0xe1   :  { %334 = vrot.lane.b32.xlu0 %v229_v14, %s1321_s19  ;;  %1260 = vmatprep.mubr.msk.f32.mxu1 %vm1320_vm2, %v1319_v9 }
  0xe2   :  { %328 = vrot.lane.b32.xlu1 %v137_v17, %s1321_s19 }
 0x14e   :  { %v327_v24 = vpop.permute.xlu1 %326 }
 0x14f   :  { %v333_v23 = vpop.permute.xlu0 %332 }
 0x150   :  { %1259 = vmatpush3.xpose.msk.msra.mxu1 %vm344_vm3, %v333_v23 }
 0x151   :  { %1268 = vmatprep.subr.mxu1 %v1319_v9 }
 0x153   :  { %v335_v26 = vpop.permute.xlu0 %334  ;;  %1261 = vmatmul.mubr.msk.f32.vlgmr.msra.gmra.mrb[4].mxu1 %vm344_vm3, %v327_v24 }
 0x154   :  { %1264 = vmatpush3.xpose.msk.msra.mxu0 %vm344_vm3, %v335_v26  ;;  %1269 = vmatpush3.msra.mxu1 %v316_v25  ;;  %v329_v28 = vpop.permute.xlu1 %328 }
 0x155   :  { %1273 = vmatprep.subr.mxu0 %v1319_v9  ;;  %1270 = vmatprep.mubr.msk.f32.mxu1 %vm1320_vm2, %v1319_v9 }
 0x156   :  { %1278 = vmatprep.subr.mxu1 %v1319_v9 }
 0x157   :  { %1266 = vmatmul.mubr.msk.f32.vlgmr.msra.gmra.mrb[6].mxu0 %vm344_vm3, %v329_v28 }
 0x158   :  { %1274 = vmatpush3.msra.mxu0 %v321_v27  ;;  %1275 = vmatprep.mubr.msk.f32.mxu0 %vm1320_vm2, %v1319_v9 }
 0x159   :  { %1283 = vmatprep.subr.mxu0 %v1319_v9 }
 0x1b2   :  { %v489_v29 = vpop.f32.mrb[4].mxu0 }
 0x1b3   :  { %v415_v30 = vpop.f32.mrb[2].mxu1  ;;  %v1257_v31 = vpop.f32.mrb[5].mxu0  ;;  %v645_v32 = vsel %vm641_vm4, %v489_v29, -inf }
 0x1b4   :  { %646 = vmax.xlane.f32.xlu1 %v645_v32  ;;  %v1252_v33 = vpop.f32.mrb[3].mxu1  ;;  %v642_v34 = vsel %vm641_vm4, %v415_v30, -inf }
 0x1b5   :  { %643 = vmax.xlane.f32.xlu0 %v642_v34 }
 0x226   :  { %v563_v35 = vpop.f32.mrb[4].mxu1 }
 0x227   :  { %v1262_v36 = vpop.f32.mrb[5].mxu1  ;;  %v648_v37 = vsel %vm641_vm4, %v563_v35, -inf }
 0x228   :  { %649 = vmax.xlane.f32.xlu0 %v648_v37 }
 0x22a   :  { %v637_v38 = vpop.f32.mrb[6].mxu0 }
 0x22b   :  { %v1267_v39 = vpop.f32.mrb[7].mxu0  ;;  %v651_v40 = vsel %vm641_vm4, %v637_v38, -inf }
 0x22c   :  { %652 = vmax.xlane.f32.xlu0 %v651_v40 }
 0x241   :  { %v647_v41 = vpop.xlane.xlu1 %646 }
 0x242   :  { %v655_v42 = vsub.f32 %v489_v29, %v647_v41  ;;  %v644_v43 = vpop.xlane.xlu0 %643 }
 0x243   :  { %v654_v44 = vsub.f32 %v415_v30, %v644_v43 }
 0x244   :  { %v660_v45 = vmul.f32 1.442695, %v655_v42 }
 0x245   :  { %v658_v46 = vmul.f32 1.442695, %v654_v44 }
 0x246   :  { %1303 = vpow2.f32 %v660_v45 }
 0x247   :  { %1305 = vpow2.f32 %v658_v46 }
 0x250   :  { %v1304_v47 = vpop.eup %1303 }
 0x251   :  { %v1306_v48 = vpop.eup %1305  ;;  %v669_v49 = vsel %vm641_vm4, %v1304_v47, 0.0 }
 0x252   :  { %670 = vadd.xlane.f32.xlu0 %v669_v49  ;;  %v666_v50 = vsel %vm641_vm4, %v1306_v48, 0.0 }
 0x253   :  { %667 = vadd.xlane.f32.xlu1 %v666_v50 }
 0x2b5   :  { %v650_v51 = vpop.xlane.xlu0 %649 }
 0x2b6   :  { %v656_v52 = vsub.f32 %v563_v35, %v650_v51 }
 0x2b8   :  { %v662_v53 = vmul.f32 1.442695, %v656_v52 }
 0x2b9   :  { %v653_v54 = vpop.xlane.xlu0 %652 }
 0x2ba   :  { %1307 = vpow2.f32 %v662_v53  ;;  %v657_v55 = vsub.f32 %v637_v38, %v653_v54 }
 0x2bc   :  { %v664_v56 = vmul.f32 1.442695, %v657_v55 }
 0x2be   :  { %1309 = vpow2.f32 %v664_v56 }
 0x2c4   :  { %v1308_v57 = vpop.eup %1307 }
 0x2c5   :  { %v672_v58 = vsel %vm641_vm4, %v1308_v57, 0.0 }
 0x2c6   :  { %673 = vadd.xlane.f32.xlu1 %v672_v58 }
 0x2c8   :  { %v1310_v59 = vpop.eup %1309 }
 0x2c9   :  { %v675_v60 = vsel %vm641_vm4, %v1310_v59, 0.0 }
 0x2ca   :  { %676 = vadd.xlane.f32.xlu0 %v675_v60 }
 0x2d7   :  { %338 = vrot.lane.b32.xlu1 %v316_v25, %s1321_s19 }
 0x2df   :  { %v671_v61 = vpop.xlane.xlu0 %670 }
 0x2e0   :  { %1311 = vrcp.f32 %v671_v61  ;;  %v668_v62 = vpop.xlane.xlu1 %667  ;;  %340 = vrot.lane.b32.xlu0 %v321_v27, %s1321_s19 }
 0x2e1   :  { %1313 = vrcp.f32 %v668_v62 }
 0x2ea   :  { %v1312_v63 = vpop.eup %1311 }
 0x2eb   :  { %v1314_v0 = vpop.eup %1313  ;;  %v683_v1 = vmul.f32 %v1312_v63, %v1304_v47 }
 0x2ec   :  { %v682_v2 = vmul.f32 %v1314_v0, %v1306_v48 }
 0x2ed   :  { %687 = vst.msk [vmem:[%s1526_s12 + $0x8] sm:$0xff] %vm641_vm4, %v683_v1  ;;  %1276 = vmatmul.mubr.msk.f32.vlgmr.msra.gmra.mrb[8].mxu0 %vm641_vm4, %v683_v1 }
 0x2ee   :  { %686 = vst.msk [vmem:[%s1526_s12] sm:$0xff] %vm641_vm4, %v682_v2  ;;  %1271 = vmatmul.mubr.msk.f32.vlgmr.msra.gmra.mrb[6].mxu1 %vm641_vm4, %v682_v2  ;;  %1285 = vmatprep.mubr.msk.f32.mxu0 %vm1320_vm2, %v1319_v9 }
 0x2ef   :  { %1280 = vmatprep.mubr.msk.f32.mxu1 %vm1320_vm2, %v1319_v9  ;;  %v982_v9 = vld [vmem:[%s1527_s9] sm:$0xf] }
 0x2f0   :  { %v984_v12 = vrot.slane %v982_v9, 2 }
 0x353   :  { %v674_v3 = vpop.xlane.xlu1 %673 }
 0x354   :  { %1315 = vrcp.f32 %v674_v3 }
 0x357   :  { %v339_v4 = vpop.permute.xlu1 %338  ;;  %v677_v5 = vpop.xlane.xlu0 %676 }
 0x358   :  { %1317 = vrcp.f32 %v677_v5  ;;  %1279 = vmatpush3.msra.mxu1 %v339_v4 }
 0x359   :  { %1288 = vmatprep.subr.msk.mxu1 %vm991_vm5, %v984_v12 }
 0x35b   :  { %v341_v6 = vpop.permute.xlu0 %340 }
 0x35c   :  { %1284 = vmatpush3.msra.mxu0 %v341_v6 }
 0x35e   :  { %v1316_v7 = vpop.eup %1315 }
 0x35f   :  { %v684_v8 = vmul.f32 %v1316_v7, %v1308_v57 }
 0x361   :  { %688 = vst.msk [vmem:[%s1526_s12 + $0x10] sm:$0xff] %vm641_vm4, %v684_v8  ;;  %1281 = vmatmul.mubr.msk.f32.vlgmr.msra.gmra.mrb[8].mxu1 %vm641_vm4, %v684_v8 }
 0x362   :  { %v1318_v10 = vpop.eup %1317  ;;  %1289 = vmatpush3.msk.msra.mxu1 %vm991_vm5, %v984_v12 }
 0x363   :  { %v685_v11 = vmul.f32 %v1318_v10, %v1310_v59  ;;  %1293 = vmatprep.subr.msk.mxu1 %vm991_vm5, %v982_v9 }
 0x365   :  { %689 = vst.msk [vmem:[%s1526_s12 + $0x18] sm:$0xff] %vm641_vm4, %v685_v11  ;;  %1286 = vmatmul.mubr.msk.f32.vlgmr.msra.gmra.mrb[10].mxu0 %vm641_vm4, %v685_v11 }
 0x3c0   :  { %v832_v13 = vpop.f32.mrb[8].mxu0 }
 0x3c1   :  { %v759_v14 = vpop.f32.mrb[6].mxu1  ;;  %v1277_v15 = vpop.f32.mrb[9].mxu0 }
 0x3c2   :  { %v1272_v16 = vpop.f32.mrb[7].mxu1 }
 0x434   :  { %v905_v17 = vpop.f32.mrb[8].mxu1 }
 0x435   :  { %v1282_v18 = vpop.f32.mrb[9].mxu1  ;;  %1290 = vmatprep.mubr.msk.f32.mxu1 %vm344_vm3, %v905_v17 }
 0x438   :  { %v978_v19 = vpop.f32.mrb[10].mxu0 }
 0x439   :  { %v1287_v20 = vpop.f32.mrb[11].mxu0  ;;  %1291 = vmatmul.mubr.msk.f32.vlgmr.msra.gmra.mrb[10].mxu1 %vm344_vm3, %v978_v19 }
 0x43a   :  { %1294 = vmatpush3.msk.msra.mxu1 %vm991_vm5, %v982_v9  ;;  %1295 = vmatprep.mubr.msk.f32.mxu1 %vm344_vm3, %v759_v14 }
 0x441   :  { %1296 = vmatmul.mubr.msk.f32.vlgmr.msra.gmra.mrb[10].mxu1 %vm344_vm3, %v832_v13 }
 0x514   :  { %v1297_v22 = vpop.f32.mrb[10].mxu1 }
 0x515   :  { %v1160_v23 = vadd.f32 %v1297_v22, %v1201_v21  ;;  %v1143_v24 = vpop.f32.mrb[11].mxu1 }
 0x516   :  { %v1159_v25 = vadd.f32 %v1201_v21, %v1143_v24 }
 0x517   :  { %1162 = vst [vmem:[%s1529_s11 + $0x8] sm:$0xff] %v1160_v23 }
 0x518   :  { %1161 = vst [vmem:[%s1529_s11] sm:$0xff] %v1159_v25 }

</bundles_post_ra>
